<compile_context>
chip_gen: v5e
topology: v5e:2x2
jax: 0.10.0
libtpu: 0.0.40
codegen_flags: <defaults>
</compile_context>

<pallas_src>
import jax
import jax.numpy as jnp
from jax.experimental import pallas as pl
from jax.experimental.pallas import tpu as pltpu


def _round_up(x, m):
    return ((x + m - 1) // m) * m


def _patch_embed_kernel(x_ref, w_ref, b_ref, o_ref):
    # x_ref: (TM, K)  bf16 patch rows for this tile
    # w_ref: (K, Ep)  bf16 projection weight (lane-padded, resident)
    # b_ref: (1, Ep)  f32 bias (resident, pre-cast on host)
    # o_ref: (TM, Ep) output embeddings (bf16 by default)
    acc = jnp.dot(x_ref[...], w_ref[...], preferred_element_type=jnp.float32)
    o_ref[...] = (acc + b_ref[...]).astype(o_ref.dtype)


def video_patch_embed(x, weight, bias, patch_size, *, tile_m=1024,
                      compute_dtype=jnp.bfloat16, out_dtype=None,
                      pad_k_to_128=False):
    """x: (B, C, T, H, W); weight: (E, C, 1, P, P); bias: (E,).

    Returns (B, T * (H//P) * (W//P), E) in `out_dtype` (defaults to
    `compute_dtype`, i.e. bf16) — matches `proj(x).flatten(2).transpose(1, 2)`
    of the PyTorch module (norm_layer=None -> Identity).

    Notes:
      * Inputs/weights are cast to `compute_dtype` (bf16) before the MXU with
        f32 accumulation. Pass compute_dtype=out_dtype=jnp.float32 for
        bit-closer parity with the f32 Conv3d reference.
      * If H or W is not divisible by P, border pixels are dropped — the same
        behavior as Conv3d with stride == kernel (VALID).
    """
    B, C, T, H, W = x.shape
    E = weight.shape[0]
    P = patch_size
    Hp, Wp = H // P, W // P
    if (Hp * P, Wp * P) != (H, W):           # Conv3d VALID drops the border
        x = x[:, :, :, :Hp * P, :Wp * P]
    N = B * T * Hp * Wp
    K = C * P * P
    if out_dtype is None:
        out_dtype = compute_dtype

    # Patch extraction expressed as reshape/transpose/cast. It is NOT a
    # separate HBM pass: allow_input_fusion lets XLA fuse this producer chain
    # into the pallas_call operand.
    xm = (x.reshape(B, C, T, Hp, P, Wp, P)
            .transpose(0, 2, 3, 5, 1, 4, 6)       # (B, T, Hp, Wp, C, P, P)
            .reshape(N, K)
            .astype(compute_dtype))               # (N, K), C-major patch rows

    wm = weight.reshape(E, K).T.astype(compute_dtype)   # (K, E)
    bm = bias.astype(jnp.float32).reshape(1, E)          # f32 bias, hoisted

    # Lane-dense output: pad E up to a multiple of 128 (weight/bias pad is
    # tiny; only matters for small embed dims).
    Ep = max(_round_up(E, 128), 128)
    if Ep != E:
        wm = jnp.pad(wm, ((0, 0), (0, Ep - E)))
        bm = jnp.pad(bm, ((0, 0), (0, Ep - E)))

    # Optional K alignment (v5e: MXU-bound, ragged K wastes systolic passes).
    Kp = K
    if pad_k_to_128 and K % 128 != 0:
        Kp = _round_up(K, 128)
        xm = jnp.pad(xm, ((0, 0), (0, Kp - K)))
        wm = jnp.pad(wm, ((0, Kp - K), (0, 0)))

    # Row tile: large enough to amortize the ~0.35us per-step overhead and
    # fill the MXU; capped (8-aligned) by the patch count. The ragged last
    # block is masked by Pallas — no explicit pad/slice over N.
    tm = _round_up(min(tile_m, _round_up(N, 8)), 8)
    grid = (pl.cdiv(N, tm),)   # >> 2 steps at real sizes -> shards across v7x TCs

    out = pl.pallas_call(
        _patch_embed_kernel,
        out_shape=jax.ShapeDtypeStruct((N, Ep), out_dtype),
        grid=grid,
        in_specs=[
            # streaming patch-row tile (double-buffered by default)
            pl.BlockSpec((tm, Kp), lambda i: (i, 0)),
            # resident weight / bias: constant index_map -> single buffer
            pl.BlockSpec((Kp, Ep), lambda i: (0, 0),
                         pipeline_mode=pl.Buffered(1)),
            pl.BlockSpec((1, Ep), lambda i: (0, 0),
                         pipeline_mode=pl.Buffered(1)),
        ],
        out_specs=pl.BlockSpec((tm, Ep), lambda i: (i, 0)),
        compiler_params=pltpu.CompilerParams(
            dimension_semantics=("parallel",),
            vmem_limit_bytes=32 * 1024 * 1024,   # safe on v5e/v6e/v7x
            # fuse the patch-extraction producer into operand 0 only
            allow_input_fusion=[True, False, False],
        ),
    )(xm, wm, bm)

    if Ep != E:
        out = out[:, :E]
    # flatten(2).transpose(1, 2): (B, E, T, Hp, Wp) -> (B, T*Hp*Wp, E)
    return out.reshape(B, T * Hp * Wp, E)


# ----------------------------------------------------------------------------
# References for correctness checks
# ----------------------------------------------------------------------------

def _reference_conv_f32(x, weight, bias, patch_size):
    P = patch_size
    y = jax.lax.conv_general_dilated(
        x, weight,
        window_strides=(1, P, P),
        padding="VALID",
        dimension_numbers=("NCDHW", "OIDHW", "NCDHW"),
    )
    y = y + bias.reshape(1, -1, 1, 1, 1)
    B = y.shape[0]
    return y.reshape(B, y.shape[1], -1).transpose(0, 2, 1)


def _reference_bf16_gemm(x, weight, bias, patch_size):
    # Same math path as the kernel (bf16 inputs, f32 accumulation), f32 result.
    B, C, T, H, W = x.shape
    E = weight.shape[0]
    P = patch_size
    Hp, Wp = H // P, W // P
    N, K = B * T * Hp * Wp, C * P * P
    xm = (x.reshape(B, C, T, Hp, P, Wp, P)
           .transpose(0, 2, 3, 5, 1, 4, 6)
           .reshape(N, K).astype(jnp.bfloat16))
    wm = weight.reshape(E, K).T.astype(jnp.bfloat16)
    out = jnp.dot(xm, wm, preferred_element_type=jnp.float32) + bias[None, :]
    return out.reshape(B, T * Hp * Wp, E)


if __name__ == "__main__":
    # Small shapes consistent with the module:
    #   img_size=16, patch_size=8, in_chans=3, embed_dim=32, frames=3, batch=2
    B, C, T, H, W = 2, 3, 3, 16, 16
    P, E = 8, 32

    key = jax.random.PRNGKey(0)
    kx, kw, kb = jax.random.split(key, 3)
    x = jax.random.normal(kx, (B, C, T, H, W), dtype=jnp.float32)
    weight = jax.random.normal(kw, (E, C, 1, P, P), dtype=jnp.float32) * 0.02
    bias = jax.random.normal(kb, (E,), dtype=jnp.float32) * 0.02

    n_tok = T * (H // P) * (W // P)
    ref_exact = _reference_bf16_gemm(x, weight, bias, P)   # same math path, f32
    ref_conv = _reference_conv_f32(x, weight, bias, P)     # f32 Conv3d semantics

    def check(out):
        out = jax.block_until_ready(out)
        assert out.shape == (B, n_tok, E), out.shape
        o32 = out.astype(jnp.float32)
        # Same math path (bf16 in, f32 acc); slack for bf16 output rounding.
        assert jnp.allclose(o32, ref_exact, atol=1e-2, rtol=1e-2), (
            float(jnp.max(jnp.abs(o32 - ref_exact))))
        # Semantic check vs the f32 Conv3d reference.
        assert jnp.allclose(o32, ref_conv, atol=3e-2, rtol=3e-2), (
            float(jnp.max(jnp.abs(o32 - ref_conv))))

    # Default path (large tile -> single grid step at this size).
    check(video_patch_embed(x, weight, bias, P))
    # Exercise the ragged last block (N=24, tm=16 -> masked tail).
    check(video_patch_embed(x, weight, bias, P, tile_m=16))
    # v5e-style K alignment path (K=192 -> padded to 256).
    check(video_patch_embed(x, weight, bias, P, pad_k_to_128=True))
    # f32-output escape hatch.
    check(video_patch_embed(x, weight, bias, P, out_dtype=jnp.float32))

    print("KERNEL_OK")
</pallas_src>

<mosaic_0001>
module attributes {stable_mosaic.version = 11 : i64} {
  func.func @_patch_embed_kernel(%arg0: i32, %arg1: memref<24x192xbf16, #tpu.memory_space<vmem>>, %arg2: memref<192x128xbf16, #tpu.memory_space<vmem>>, %arg3: memref<1x128xf32, #tpu.memory_space<vmem>>, %arg4: memref<24x128xbf16, #tpu.memory_space<vmem>>) attributes {dimension_semantics = [#tpu.dimension_semantics<parallel>], iteration_bounds = array<i64: 1>, scalar_prefetch = 0 : i64, scratch_operands = 0 : i64, tpu.core_type = #tpu.core_type<tc>, window_params = [{transform_indices = @transform_0, window_bounds = array<i64: 24, 192>}, {pipeline_mode = #tpu.pipeline_mode<synchronous>, transform_indices = @transform_1, window_bounds = array<i64: 192, 128>}, {pipeline_mode = #tpu.pipeline_mode<synchronous>, transform_indices = @transform_2, window_bounds = array<i64: 1, 128>}, {transform_indices = @transform_3, window_bounds = array<i64: 24, 128>}]} {
    %c0 = arith.constant 0 : index
    %c0_0 = arith.constant 0 : index
    %0 = vector.load %arg1[%c0, %c0_0] : memref<24x192xbf16, #tpu.memory_space<vmem>>, vector<24x192xbf16>
    %c0_1 = arith.constant 0 : index
    %c0_2 = arith.constant 0 : index
    %1 = vector.load %arg2[%c0_1, %c0_2] : memref<192x128xbf16, #tpu.memory_space<vmem>>, vector<192x128xbf16>
    %cst = arith.constant dense<0.000000e+00> : vector<24x128xf32>
    %2 = tpu.matmul %0, %1, %cst {dimension_numbers = #tpu.dot_dimension_numbers<[1], [0], [0], [1], [0, 0, 1, 1], [], []>} : vector<24x192xbf16>, vector<192x128xbf16>, vector<24x128xf32> -> vector<24x128xf32>
    %c0_3 = arith.constant 0 : index
    %c0_4 = arith.constant 0 : index
    %3 = vector.load %arg3[%c0_3, %c0_4] : memref<1x128xf32, #tpu.memory_space<vmem>>, vector<1x128xf32>
    %4 = vector.broadcast %3 : vector<1x128xf32> to vector<24x128xf32>
    %5 = arith.addf %2, %4 : vector<24x128xf32>
    %6 = arith.truncf %5 : vector<24x128xf32> to vector<24x128xbf16>
    %c0_5 = arith.constant 0 : index
    %c0_6 = arith.constant 0 : index
    %7 = vector.load %arg4[%c0_5, %c0_6] : memref<24x128xbf16, #tpu.memory_space<vmem>>, vector<24x128xbf16>
    tpu.vector_store %arg4[%c0_5, %c0_6], %6 {strides = array<i32>} : memref<24x128xbf16, #tpu.memory_space<vmem>>, vector<24x128xbf16>,
    return
  }
  func.func @transform_0(%arg0: i32) -> (i32, i32) {
    %c0_i32 = arith.constant 0 : i32
    %c0_i32_0 = arith.constant 0 : i32
    return %arg0, %c0_i32 : i32, i32
  }
  func.func @transform_1(%arg0: i32) -> (i32, i32) {
    %c0_i32 = arith.constant 0 : i32
    %c0_i32_0 = arith.constant 0 : i32
    %c0_i32_1 = arith.constant 0 : i32
    return %c0_i32, %c0_i32_0 : i32, i32
  }
  func.func @transform_2(%arg0: i32) -> (i32, i32) {
    %c0_i32 = arith.constant 0 : i32
    %c0_i32_0 = arith.constant 0 : i32
    %c0_i32_1 = arith.constant 0 : i32
    return %c0_i32, %c0_i32_0 : i32, i32
  }
  func.func @transform_3(%arg0: i32) -> (i32, i32) {
    %c0_i32 = arith.constant 0 : i32
    %c0_i32_0 = arith.constant 0 : i32
    return %arg0, %c0_i32 : i32, i32
  }
}

</mosaic_0001>

<bundles_post_ra>
// kernel: tpu_custom_call.1
= control target key start
LH: loop header
LB: loop body
LE: loop exit
PB: predicated region body
PF: predicated region fallthrough
CT: control target
= control target key end

     0   :  { %8 = vsyncpa [#allocation3], 0  ;;  %s453_s0 = inlined_call_operand.hbm [shape: bf16[24,192], index: 0, kind: input, shape index: {}]   ;;  %s454_s1 = inlined_call_operand.hbm [shape: bf16[192,128], index: 1, kind: input, shape index: {}]   ;;  %s455_s2 = inlined_call_operand.vmem [shape: f32[1,128], index: 2, kind: input, shape index: {}]   ;;  %s456_s3 = inlined_call_operand.hbm [shape: bf16[24,128], index: 3, kind: output, shape index: {}]  }
   0x1   :  { %9 = vsyncpa [#allocation6], 0 }
   0x2   :  { %10 = vsyncpa [#allocation4], 0  ;;  %s15_s14 = sshll.u32 %s453_s0, 4  ;;  %s406_s15 = smov [#allocation2]   ;;  %s16_s14 = int_to_ptr.hbm [resolvable:$true] %s15_s14 }
   0x3   :  { %s17_s16 = sshll.u32 %s406_s15, 4  ;;  %s28_s19 = sshll.u32 %s454_s1, 4  ;;  %s18_s16 = int_to_ptr.vmem [resolvable:$true] %s17_s16  ;;  %s29_s19 = int_to_ptr.hbm [resolvable:$true] %s28_s19 }
   0x4   :  { %s407_s20 = smov 128   ;;  %s408_s21 = smov 8  }
   0x5   :  { %23 = dma.hbm_to_vmem [thread:$0]  %s16_s14, 384, %s18_s16, [#allocation3], %s407_s20, %s407_s20, %s408_s21  }
   0x6   :  { %s409_s22 = smov [#allocation5]   ;;  %s410_s24 = smov 64  }
   0x7   :  { %s30_s23 = sshll.u32 %s409_s22, 4  ;;  %s411_s25 = smov 4   ;;  %s31_s23 = int_to_ptr.vmem [resolvable:$true] %s30_s23 }
   0x8   :  { %36 = dma.hbm_to_vmem [thread:$0]  %s29_s19, 1536, %s31_s23, [#allocation6], %s410_s24, %s410_s24, %s411_s25  }
   0x9   :  { %400 = dma.done.wait [#allocation3], 384  }
   0xa   :  { %401 = vsyncadd [#allocation3], 4294966912 }
   0xb   :  { %402 = dma.done.wait [#allocation6], 1536  }
   0xc   :  { %403 = vsyncadd [#allocation6], 4294965760  ;;  %v302_v0 = vld [vmem:[#allocation5 + $0x38] sm:$0xff]  ;;  %v301_v2 = vld [vmem:[#allocation5 + $0x30] sm:$0xff]  ;;  %vm166_vm0 = vcmask 523264   ;;  %s412_s26 = smov [#allocation7]  }
   0xd   :  { %v306_v1 = vld [vmem:[#allocation5 + $0x58] sm:$0xff]  ;;  %173 = vmatpush.bf16.msra.mxu0 %v302_v0  ;;  %312 = vmatpush.bf16.msra.mxu2 %v302_v0  ;;  %v305_v3 = vld [vmem:[#allocation5 + $0x50] sm:$0xff]  ;;  %v300_v4 = vld [vmem:[#allocation5 + $0x28] sm:$0xff]  ;;  %s219_s27 = sshll.u32 %s412_s26, 4  ;;  %s221_s30 = sshll.u32 %s456_s3, 4  ;;  %s220_s27 = int_to_ptr.vmem [resolvable:$true] %s219_s27  ;;  %s222_s30 = int_to_ptr.hbm [resolvable:$true] %s221_s30 }
   0xe   :  { %195 = vmatpush.bf16.msra.mxu1 %v306_v1  ;;  %v304_v5 = vld [vmem:[#allocation5 + $0x48] sm:$0xff]  ;;  %v299_v6 = vld [vmem:[#allocation5 + $0x20] sm:$0xff]  ;;  %v239_v9 = vld [vmem:[#allocation2 + $0x8] sm:$0xf0] }
   0xf   :  { %v303_v7 = vld [vmem:[#allocation5 + $0x40] sm:$0xff]  ;;  %v293_v8 = vld [vmem:[#allocation2 + $0x4] sm:$0xf]  ;;  %v298_v11 = vld [vmem:[#allocation5 + $0x18] sm:$0xff] }
  0x10   :  { %v242_v10 = vor.u32 %v293_v8, %v239_v9  ;;  %v297_v12 = vld [vmem:[#allocation5 + $0x10] sm:$0xff]  ;;  %v296_v13 = vld [vmem:[#allocation5 + $0x8] sm:$0xff]  ;;  %v50_v14 = vld [vmem:[#allocation2 + $0x10] sm:$0xff] }
  0x11   :  { %174 = vmatpush.bf16.msra.mxu0 %v301_v2  ;;  %313 = vmatpush.bf16.msra.mxu2 %v301_v2  ;;  %v295_v15 = vld [vmem:[#allocation5] sm:$0xff]  ;;  %v237_v16 = vld [vmem:[#allocation2] sm:$0xf]  ;;  %v294_v17 = vld [vmem:[#allocation2 + $0x4] sm:$0xf0]  ;;  %v86_v18 = vunpack.c.l.b16 %v50_v14  ;;  %v87_v19 = vunpack.c.h.b16 %v50_v14 }
  0x12   :  { %196 = vmatpush.bf16.msra.mxu1 %v305_v3  ;;  %v238_v20 = vor.u32 %v294_v17, %v237_v16  ;;  %v327_v27 = vld [vmem:[%s455_s2] ss:$0 sm:$0xff] }
  0x13   :  { %v90_v21 = vpack.c.b16 %v86_v18, %v86_v18  ;;  %v91_v22 = vpack.c.b16 %v87_v19, %v87_v19 }
  0x15   :  { %175 = vmatpush.bf16.msra.mxu0 %v300_v4  ;;  %314 = vmatpush.bf16.msra.mxu2 %v300_v4 }
  0x16   :  { %197 = vmatpush.bf16.msra.mxu1 %v304_v5 }
  0x19   :  { %176 = vmatpush.bf16.msra.mxu0 %v299_v6  ;;  %315 = vmatpush.bf16.msra.mxu2 %v299_v6 }
  0x1a   :  { %198 = vmatpush.bf16.msra.mxu1 %v303_v7 }
  0x1d   :  { %291 = vmatmul.msk.bf16.vlgmr.msra.gmra.mxu1 %vm166_vm0, %v242_v10  ;;  %177 = vmatpush.bf16.msra.mxu0 %v298_v11 }
  0x1e   :  { %316 = vmatpush.bf16.msra.mxu2 %v298_v11 }
  0x21   :  { %178 = vmatpush.bf16.msra.mxu0 %v297_v12 }
  0x22   :  { %317 = vmatpush.bf16.msra.mxu2 %v297_v12 }
  0x25   :  { %179 = vmatpush.bf16.msra.mxu0 %v296_v13 }
  0x26   :  { %318 = vmatpush.bf16.msra.mxu2 %v296_v13 }
  0x29   :  { %180 = vmatpush.bf16.msra.mxu0 %v295_v15 }
  0x2a   :  { %319 = vmatpush.bf16.msra.mxu2 %v295_v15 }
  0x2c   :  { %181 = vmatmul.bf16.vlgmr.msra.gmra.mxu0 %v238_v20 }
  0x2d   :  { %186 = vmatmul.bf16.vlgmr.msra.gmra.mxu2 %v90_v21  ;;  %292 = vmatmul.msk.bf16.gmra.mxu1 %vm166_vm0, %v91_v22 }
  0x9a   :  { %v200_v23 = vpop.f32.mrf.mxu1 }
  0xa2   :  { %v202_v24 = vpop.f32.mrf.mxu1 }
  0xa9   :  { %v182_v25 = vpop.f32.mrf.mxu0 }
  0xaa   :  { %v205_v26 = vpop.f32.mrf.mxu1  ;;  %v183_v28 = vadd.f32 %v327_v27, %v182_v25 }
  0xac   :  { %v201_v35 = vadd.f32 %v200_v23, %v183_v28 }
  0xb0   :  { %v187_v29 = vpop.f32.mrf.mxu2 }
  0xb1   :  { %v188_v30 = vadd.f32 %v327_v27, %v187_v29  ;;  %v184_v31 = vpop.f32.mrf.mxu0 }
  0xb2   :  { %v185_v32 = vadd.f32 %v327_v27, %v184_v31  ;;  %v207_v33 = vpop.f32.mrf.mxu1 }
  0xb3   :  { %v206_v34 = vadd.f32 %v205_v26, %v188_v30 }
  0xb4   :  { %v203_v36 = vadd.f32 %v202_v24, %v185_v32 }
  0xb5   :  { %v211_v37 = vpack.c.bf16 %v206_v34, %v206_v34 }
  0xb6   :  { %v310_v38 = vpack.c.bf16 %v203_v36, %v201_v35 }
  0xb7   :  { %214 = vst [vmem:[#allocation7 + $0x8] sm:$0xf] %v211_v37 }
  0xb8   :  { %311 = vst [vmem:[#allocation7] sm:$0xff] %v310_v38   ;;  %v189_v39 = vpop.f32.mrf.mxu2 }
  0xb9   :  { %227 = dma.vmem_to_hbm [thread:$0]  %s220_s27, 192, %s222_s30, [#allocation4], %s410_s24, %s410_s24, %s411_s25  }
  0xba   :  { %404 = dma.done.wait [#allocation4], 192  }
  0xbb   :  { %405 = vsyncadd [#allocation4], 4294967104 }
  0xbc   :  { %232 = vsyncpa [#allocation3], 1 }
  0xbd   :  { %233 = vsyncpa [#allocation6], 1 }
  0xbe   :  { %234 = vsyncpa [#allocation4], 1 }

</bundles_post_ra>
